<compile_context>
chip_gen: v5e
topology: v5e:2x2
jax: 0.10.0
libtpu: 0.0.40
codegen_flags: <defaults>
</compile_context>

<pallas_src>
import jax
import jax.numpy as jnp
from jax.experimental import pallas as pl
from jax.experimental.pallas import tpu as pltpu

IN_FEATURES = 30               # neuronasEntrada
MULT = 2                       # multiplicadorNeuronas
H1 = MULT * IN_FEATURES        # 60
H2 = MULT * IN_FEATURES // 2   # 30
H3 = MULT * IN_FEATURES // 4   # 15
OUT = 10

DEFAULT_TB = 2048              # batch tile (rows per grid step), multiple of 8


def _round_up(x, m):
    return ((x + m - 1) // m) * m


def mlp_kernel(x_ref,
               w1_ref, b1_ref,
               w3_ref, b3_ref,
               w4_ref, b4_ref,
               w2_ref, b2_ref,
               o_ref):
    # x tile is f32 (TB, 30); cast to bf16 here (VPU op, hidden under the MXU)
    # instead of in the wrapper, which would cost an extra HBM pass.
    x = x_ref[...].astype(jnp.bfloat16)

    # fc1 + relu
    h = jnp.dot(x, w1_ref[...], preferred_element_type=jnp.float32) + b1_ref[...]
    h = jnp.maximum(h, 0.0)

    # fc3 + relu
    h = jnp.dot(h.astype(jnp.bfloat16), w3_ref[...],
                preferred_element_type=jnp.float32) + b3_ref[...]
    h = jnp.maximum(h, 0.0)

    # fc4 + relu
    h = jnp.dot(h.astype(jnp.bfloat16), w4_ref[...],
                preferred_element_type=jnp.float32) + b4_ref[...]
    h = jnp.maximum(h, 0.0)

    # fc2 (logits)
    logits = jnp.dot(h.astype(jnp.bfloat16), w2_ref[...],
                     preferred_element_type=jnp.float32) + b2_ref[...]

    # log_softmax along features (dim=1), numerically stable, in f32.
    m = jnp.max(logits, axis=-1, keepdims=True)
    # min(.,0) is exact for valid rows (logits - max <= 0) and keeps exp()
    # finite on the undefined rows of a padded last tile (masked on writeback).
    shifted = jnp.minimum(logits - m, 0.0)
    lse = jnp.log(jnp.sum(jnp.exp(shifted), axis=-1, keepdims=True))
    o_ref[...] = shifted - lse


def prepare_params(params):
    """Convert weights to bf16 once (outside the per-call path). Biases stay f32."""
    p = dict(params)
    for k in ("w1", "w3", "w4", "w2"):
        p[k] = params[k].astype(jnp.bfloat16)
    return p


def net_forward(x, params, *, tb=DEFAULT_TB):
    """x: (B, 30) float32.
    params: dict of (in, out) weights (bf16 preferred, see prepare_params) and
    (1, out) f32 biases."""
    B = x.shape[0]
    # Batch tile: multiple of 8 (sublane aligned), capped by `tb`, and small
    # enough that the grid has >= 2 steps whenever B allows (keeps both v7x
    # TensorCores busy via the "parallel" batch axis).
    TB = min(tb, _round_up(pl.cdiv(B, 2), 8))
    grid = (pl.cdiv(B, TB),)

    # No-ops when weights were pre-converted via prepare_params().
    w1 = params["w1"].astype(jnp.bfloat16)
    w3 = params["w3"].astype(jnp.bfloat16)
    w4 = params["w4"].astype(jnp.bfloat16)
    w2 = params["w2"].astype(jnp.bfloat16)
    b1, b3, b4, b2 = params["b1"], params["b3"], params["b4"], params["b2"]

    const = lambda shape: pl.BlockSpec(shape, lambda i: (0, 0))  # resident across grid
    in_specs = [
        pl.BlockSpec((TB, IN_FEATURES), lambda i: (i, 0)),   # x tile (f32)
        const((IN_FEATURES, H1)), const((1, H1)),            # fc1
        const((H1, H2)),          const((1, H2)),            # fc3
        const((H2, H3)),          const((1, H3)),            # fc4
        const((H3, OUT)),         const((1, OUT)),           # fc2
    ]
    out_specs = pl.BlockSpec((TB, OUT), lambda i: (i, 0))

    # Advisory cost hint for XLA scheduling.
    flops = 2 * B * (IN_FEATURES * H1 + H1 * H2 + H2 * H3 + H3 * OUT)
    weight_bytes = 2 * (IN_FEATURES * H1 + H1 * H2 + H2 * H3 + H3 * OUT) \
                   + 4 * (H1 + H2 + H3 + OUT)
    bytes_accessed = B * (IN_FEATURES * 4 + OUT * 4) + weight_bytes
    cost = pl.CostEstimate(flops=flops,
                           transcendentals=B * OUT,
                           bytes_accessed=bytes_accessed)

    return pl.pallas_call(
        mlp_kernel,
        out_shape=jax.ShapeDtypeStruct((B, OUT), jnp.float32),
        grid=grid,
        in_specs=in_specs,
        out_specs=out_specs,
        compiler_params=pltpu.CompilerParams(
            dimension_semantics=("parallel",)),   # shards batch tiles across TCs on v7x
        cost_estimate=cost,
    )(x, w1, b1, w3, b3, w4, b4, w2, b2)


def init_params(key):
    """Deterministic init mimicking nn.Linear's uniform(-1/sqrt(fan_in), 1/sqrt(fan_in))."""
    def linear(key, fan_in, fan_out):
        kw, kb = jax.random.split(key)
        bound = 1.0 / jnp.sqrt(fan_in)
        # stored (in, out) so the kernel computes x @ W + b
        w = jax.random.uniform(kw, (fan_in, fan_out), jnp.float32, -bound, bound)
        b = jax.random.uniform(kb, (1, fan_out), jnp.float32, -bound, bound)
        return w, b

    k1, k3, k4, k2 = jax.random.split(key, 4)
    w1, b1 = linear(k1, IN_FEATURES, H1)
    w3, b3 = linear(k3, H1, H2)
    w4, b4 = linear(k4, H2, H3)
    w2, b2 = linear(k2, H3, OUT)
    return dict(w1=w1, b1=b1, w3=w3, b3=b3, w4=w4, b4=b4, w2=w2, b2=b2)


def net_forward_ref(x, params):
    """Pure-JAX reference with the same bf16-matmul / f32-accumulate recipe."""
    h = x.astype(jnp.bfloat16)
    for wk, bk in (("w1", "b1"), ("w3", "b3"), ("w4", "b4")):
        h = jnp.dot(h, params[wk].astype(jnp.bfloat16),
                    preferred_element_type=jnp.float32) + params[bk]
        h = jnp.maximum(h, 0.0).astype(jnp.bfloat16)
    logits = jnp.dot(h, params["w2"].astype(jnp.bfloat16),
                     preferred_element_type=jnp.float32) + params["b2"]
    return jax.nn.log_softmax(logits, axis=1)


if __name__ == "__main__":
    key = jax.random.PRNGKey(0)
    kp, kx = jax.random.split(key)
    params = prepare_params(init_params(kp))   # weights -> bf16 once

    # Small batch that still exercises a 2-step grid and a ragged last tile.
    B = 100
    x = jax.random.normal(kx, (B, IN_FEATURES), jnp.float32)

    out = net_forward(x, params)
    out = jax.block_until_ready(out)

    assert out.shape == (B, OUT)
    assert bool(jnp.all(jnp.isfinite(out)))
    # log_softmax rows must sum (in prob space) to ~1
    row_sums = jnp.sum(jnp.exp(out), axis=1)
    assert bool(jnp.all(jnp.abs(row_sums - 1.0) < 1e-4))
    # match pure-JAX reference using the same precision recipe
    ref = net_forward_ref(x, params)
    assert bool(jnp.all(jnp.abs(out - ref) < 1e-2))

    print("KERNEL_OK")
</pallas_src>

<mosaic_0001>
module attributes {stable_mosaic.version = 11 : i64} {
  func.func @mlp_kernel(%arg0: i32, %arg1: memref<56x30xf32, #tpu.memory_space<vmem>>, %arg2: memref<30x60xbf16, #tpu.memory_space<vmem>>, %arg3: memref<1x60xf32, #tpu.memory_space<vmem>>, %arg4: memref<60x30xbf16, #tpu.memory_space<vmem>>, %arg5: memref<1x30xf32, #tpu.memory_space<vmem>>, %arg6: memref<30x15xbf16, #tpu.memory_space<vmem>>, %arg7: memref<1x15xf32, #tpu.memory_space<vmem>>, %arg8: memref<15x10xbf16, #tpu.memory_space<vmem>>, %arg9: memref<1x10xf32, #tpu.memory_space<vmem>>, %arg10: memref<56x10xf32, #tpu.memory_space<vmem>>) attributes {dimension_semantics = [#tpu.dimension_semantics<parallel>], iteration_bounds = array<i64: 2>, scalar_prefetch = 0 : i64, scratch_operands = 0 : i64, tpu.core_type = #tpu.core_type<tc>, window_params = [{transform_indices = @transform_0, window_bounds = array<i64: 56, 30>}, {pipeline_mode = #tpu.pipeline_mode<synchronous>, transform_indices = @transform_1, window_bounds = array<i64: 30, 60>}, {pipeline_mode = #tpu.pipeline_mode<synchronous>, transform_indices = @transform_2, window_bounds = array<i64: 1, 60>}, {pipeline_mode = #tpu.pipeline_mode<synchronous>, transform_indices = @transform_3, window_bounds = array<i64: 60, 30>}, {pipeline_mode = #tpu.pipeline_mode<synchronous>, transform_indices = @transform_4, window_bounds = array<i64: 1, 30>}, {pipeline_mode = #tpu.pipeline_mode<synchronous>, transform_indices = @transform_5, window_bounds = array<i64: 30, 15>}, {pipeline_mode = #tpu.pipeline_mode<synchronous>, transform_indices = @transform_6, window_bounds = array<i64: 1, 15>}, {pipeline_mode = #tpu.pipeline_mode<synchronous>, transform_indices = @transform_7, window_bounds = array<i64: 15, 10>}, {pipeline_mode = #tpu.pipeline_mode<synchronous>, transform_indices = @transform_8, window_bounds = array<i64: 1, 10>}, {transform_indices = @transform_9, window_bounds = array<i64: 56, 10>}]} {
    %c0 = arith.constant 0 : index
    %c0_0 = arith.constant 0 : index
    %0 = vector.load %arg1[%c0, %c0_0] : memref<56x30xf32, #tpu.memory_space<vmem>>, vector<56x30xf32>
    %1 = arith.truncf %0 : vector<56x30xf32> to vector<56x30xbf16>
    %c0_1 = arith.constant 0 : index
    %c0_2 = arith.constant 0 : index
    %2 = vector.load %arg2[%c0_1, %c0_2] : memref<30x60xbf16, #tpu.memory_space<vmem>>, vector<30x60xbf16>
    %cst = arith.constant dense<0.000000e+00> : vector<56x60xf32>
    %3 = tpu.matmul %1, %2, %cst {dimension_numbers = #tpu.dot_dimension_numbers<[1], [0], [0], [1], [0, 0, 1, 1], [], []>} : vector<56x30xbf16>, vector<30x60xbf16>, vector<56x60xf32> -> vector<56x60xf32>
    %c0_3 = arith.constant 0 : index
    %c0_4 = arith.constant 0 : index
    %4 = vector.load %arg3[%c0_3, %c0_4] : memref<1x60xf32, #tpu.memory_space<vmem>>, vector<1x60xf32>
    %5 = vector.broadcast %4 : vector<1x60xf32> to vector<56x60xf32>
    %6 = arith.addf %3, %5 : vector<56x60xf32>
    %cst_5 = arith.constant 0.000000e+00 : f32
    %7 = vector.broadcast %cst_5 : f32 to vector<56x60xf32>
    %8 = arith.maximumf %6, %7 : vector<56x60xf32>
    %9 = arith.truncf %8 : vector<56x60xf32> to vector<56x60xbf16>
    %c0_6 = arith.constant 0 : index
    %c0_7 = arith.constant 0 : index
    %10 = vector.load %arg4[%c0_6, %c0_7] : memref<60x30xbf16, #tpu.memory_space<vmem>>, vector<60x30xbf16>
    %cst_8 = arith.constant dense<0.000000e+00> : vector<56x30xf32>
    %11 = tpu.matmul %9, %10, %cst_8 {dimension_numbers = #tpu.dot_dimension_numbers<[1], [0], [0], [1], [0, 0, 1, 1], [], []>} : vector<56x60xbf16>, vector<60x30xbf16>, vector<56x30xf32> -> vector<56x30xf32>
    %c0_9 = arith.constant 0 : index
    %c0_10 = arith.constant 0 : index
    %12 = vector.load %arg5[%c0_9, %c0_10] : memref<1x30xf32, #tpu.memory_space<vmem>>, vector<1x30xf32>
    %13 = vector.broadcast %12 : vector<1x30xf32> to vector<56x30xf32>
    %14 = arith.addf %11, %13 : vector<56x30xf32>
    %cst_11 = arith.constant 0.000000e+00 : f32
    %15 = vector.broadcast %cst_11 : f32 to vector<56x30xf32>
    %16 = arith.maximumf %14, %15 : vector<56x30xf32>
    %17 = arith.truncf %16 : vector<56x30xf32> to vector<56x30xbf16>
    %c0_12 = arith.constant 0 : index
    %c0_13 = arith.constant 0 : index
    %18 = vector.load %arg6[%c0_12, %c0_13] : memref<30x15xbf16, #tpu.memory_space<vmem>>, vector<30x15xbf16>
    %cst_14 = arith.constant dense<0.000000e+00> : vector<56x15xf32>
    %19 = tpu.matmul %17, %18, %cst_14 {dimension_numbers = #tpu.dot_dimension_numbers<[1], [0], [0], [1], [0, 0, 1, 1], [], []>} : vector<56x30xbf16>, vector<30x15xbf16>, vector<56x15xf32> -> vector<56x15xf32>
    %c0_15 = arith.constant 0 : index
    %c0_16 = arith.constant 0 : index
    %20 = vector.load %arg7[%c0_15, %c0_16] : memref<1x15xf32, #tpu.memory_space<vmem>>, vector<1x15xf32>
    %21 = vector.broadcast %20 : vector<1x15xf32> to vector<56x15xf32>
    %22 = arith.addf %19, %21 : vector<56x15xf32>
    %cst_17 = arith.constant 0.000000e+00 : f32
    %23 = vector.broadcast %cst_17 : f32 to vector<56x15xf32>
    %24 = arith.maximumf %22, %23 : vector<56x15xf32>
    %25 = arith.truncf %24 : vector<56x15xf32> to vector<56x15xbf16>
    %c0_18 = arith.constant 0 : index
    %c0_19 = arith.constant 0 : index
    %26 = vector.load %arg8[%c0_18, %c0_19] : memref<15x10xbf16, #tpu.memory_space<vmem>>, vector<15x10xbf16>
    %cst_20 = arith.constant dense<0.000000e+00> : vector<56x10xf32>
    %27 = tpu.matmul %25, %26, %cst_20 {dimension_numbers = #tpu.dot_dimension_numbers<[1], [0], [0], [1], [0, 0, 1, 1], [], []>} : vector<56x15xbf16>, vector<15x10xbf16>, vector<56x10xf32> -> vector<56x10xf32>
    %c0_21 = arith.constant 0 : index
    %c0_22 = arith.constant 0 : index
    %28 = vector.load %arg9[%c0_21, %c0_22] : memref<1x10xf32, #tpu.memory_space<vmem>>, vector<1x10xf32>
    %29 = vector.broadcast %28 : vector<1x10xf32> to vector<56x10xf32>
    %30 = arith.addf %27, %29 : vector<56x10xf32>
    %cst_23 = arith.constant dense<0xFF800000> : vector<56xf32>
    %31 = vector.multi_reduction <maximumf>, %30, %cst_23 [1] : vector<56x10xf32> to vector<56xf32>
    %32 = vector.shape_cast %31 : vector<56xf32> to vector<56x1xf32>
    %33 = vector.broadcast %32 : vector<56x1xf32> to vector<56x10xf32>
    %34 = arith.subf %30, %33 : vector<56x10xf32>
    %cst_24 = arith.constant 0.000000e+00 : f32
    %35 = vector.broadcast %cst_24 : f32 to vector<56x10xf32>
    %36 = arith.minimumf %34, %35 : vector<56x10xf32>
    %37 = math.exp %36 : vector<56x10xf32>
    %cst_25 = arith.constant dense<0.000000e+00> : vector<56xf32>
    %38 = vector.multi_reduction <add>, %37, %cst_25 [1] : vector<56x10xf32> to vector<56xf32>
    %39 = vector.shape_cast %38 : vector<56xf32> to vector<56x1xf32>
    %40 = math.log %39 : vector<56x1xf32>
    %41 = vector.broadcast %40 : vector<56x1xf32> to vector<56x10xf32>
    %42 = arith.subf %36, %41 : vector<56x10xf32>
    %c0_26 = arith.constant 0 : index
    %c0_27 = arith.constant 0 : index
    %43 = vector.load %arg10[%c0_26, %c0_27] : memref<56x10xf32, #tpu.memory_space<vmem>>, vector<56x10xf32>
    tpu.vector_store %arg10[%c0_26, %c0_27], %42 {strides = array<i32>} : memref<56x10xf32, #tpu.memory_space<vmem>>, vector<56x10xf32>,
    return
  }
  func.func @transform_0(%arg0: i32) -> (i32, i32) {
    %c0_i32 = arith.constant 0 : i32
    %c0_i32_0 = arith.constant 0 : i32
    return %arg0, %c0_i32 : i32, i32
  }
  func.func @transform_1(%arg0: i32) -> (i32, i32) {
    %c0_i32 = arith.constant 0 : i32
    %c0_i32_0 = arith.constant 0 : i32
    %c0_i32_1 = arith.constant 0 : i32
    return %c0_i32, %c0_i32_0 : i32, i32
  }
  func.func @transform_2(%arg0: i32) -> (i32, i32) {
    %c0_i32 = arith.constant 0 : i32
    %c0_i32_0 = arith.constant 0 : i32
    %c0_i32_1 = arith.constant 0 : i32
    return %c0_i32, %c0_i32_0 : i32, i32
  }
  func.func @transform_3(%arg0: i32) -> (i32, i32) {
    %c0_i32 = arith.constant 0 : i32
    %c0_i32_0 = arith.constant 0 : i32
    %c0_i32_1 = arith.constant 0 : i32
    return %c0_i32, %c0_i32_0 : i32, i32
  }
  func.func @transform_4(%arg0: i32) -> (i32, i32) {
    %c0_i32 = arith.constant 0 : i32
    %c0_i32_0 = arith.constant 0 : i32
    %c0_i32_1 = arith.constant 0 : i32
    return %c0_i32, %c0_i32_0 : i32, i32
  }
  func.func @transform_5(%arg0: i32) -> (i32, i32) {
    %c0_i32 = arith.constant 0 : i32
    %c0_i32_0 = arith.constant 0 : i32
    %c0_i32_1 = arith.constant 0 : i32
    return %c0_i32, %c0_i32_0 : i32, i32
  }
  func.func @transform_6(%arg0: i32) -> (i32, i32) {
    %c0_i32 = arith.constant 0 : i32
    %c0_i32_0 = arith.constant 0 : i32
    %c0_i32_1 = arith.constant 0 : i32
    return %c0_i32, %c0_i32_0 : i32, i32
  }
  func.func @transform_7(%arg0: i32) -> (i32, i32) {
    %c0_i32 = arith.constant 0 : i32
    %c0_i32_0 = arith.constant 0 : i32
    %c0_i32_1 = arith.constant 0 : i32
    return %c0_i32, %c0_i32_0 : i32, i32
  }
  func.func @transform_8(%arg0: i32) -> (i32, i32) {
    %c0_i32 = arith.constant 0 : i32
    %c0_i32_0 = arith.constant 0 : i32
    %c0_i32_1 = arith.constant 0 : i32
    return %c0_i32, %c0_i32_0 : i32, i32
  }
  func.func @transform_9(%arg0: i32) -> (i32, i32) {
    %c0_i32 = arith.constant 0 : i32
    %c0_i32_0 = arith.constant 0 : i32
    return %arg0, %c0_i32 : i32, i32
  }
}

</mosaic_0001>

<bundles_post_ra>
// kernel: tpu_custom_call.1
= control target key start
LH: loop header
LB: loop body
LE: loop exit
PB: predicated region body
PF: predicated region fallthrough
CT: control target
= control target key end

     0   :  { %s1351_s30 = smov 0   ;;  %s1353_s10 = smov 0   ;;  %s1558_s0 = inlined_call_operand.vmem [shape: f32[100,30], index: 0, kind: input, shape index: {}]   ;;  %s1559_s1 = inlined_call_operand.vmem [shape: bf16[30,60], index: 1, kind: input, shape index: {}]   ;;  %s1560_s2 = inlined_call_operand.vmem [shape: f32[1,60], index: 2, kind: input, shape index: {}]   ;;  %s1561_s3 = inlined_call_operand.vmem [shape: bf16[60,30], index: 3, kind: input, shape index: {}]   ;;  %s1562_s4 = inlined_call_operand.vmem [shape: f32[1,30], index: 4, kind: input, shape index: {}]   ;;  %s1563_s5 = inlined_call_operand.vmem [shape: bf16[30,15], index: 5, kind: input, shape index: {}]   ;;  %s1564_s6 = inlined_call_operand.vmem [shape: f32[1,15], index: 6, kind: input, shape index: {}]   ;;  %s1565_s7 = inlined_call_operand.vmem [shape: bf16[15,10], index: 7, kind: input, shape index: {}]   ;;  %s1566_s8 = inlined_call_operand.vmem [shape: f32[1,10], index: 8, kind: input, shape index: {}]   ;;  %s1567_s9 = inlined_call_operand.vmem [shape: f32[100,10], index: 9, kind: output, shape index: {}]  }
   0x1   :  { %s1355_s11 = smov 0  }
   0x2 LB: > { %s1364_s12 = sadd.s32 4294967295, %s1266_s11   ;;  %s1366_s13 = sadd.s32 1, %s1266_s11   ;;  %s1266_s11 = sphi %s1355_s11, %s1574_s11   ;;  %s1262_s10 = sphi %s1353_s10, %s1573_s10   ;;  %s1258_s30 = sphi %s1351_s30, %s1572_s30  }
   0x3   : > { %s217_s14 = ssub.s32 %s1266_s11, %s1366_s13  ;;  %s220_s15 = sadd.s32 1, %s1262_s10 }
   0x4   : > { %p218_p0 = scmp.eq.s32.totalorder %s217_s14, 0  ;;  %p230_p1 = scmp.ne.s32.totalorder %s1262_s10, %s1258_s30 }
   0x5   : > { %p231_p2 = scmp.eq.s32.totalorder %s1364_s12, 1  ;;  %p1007_p3 = scmp.ge.s32.totalorder %s1266_s11, 1 }
   0x6   : > { %s1374_s16 = scalar_select %p218_p0, %s1262_s10, %s220_s15  }
   0x7   : > { %p1376_p4 = por %p231_p2, %p230_p1  ;;  %p296_p5 = scmp.lt.s32.totalorder %s1266_s11, 3 }
   0x9   : > { %p297_p6 = pnand %p1007_p3, %p296_p5 }
   0xa   : > { %s1387_s22 = smul.u32 (!%p297_p6), 7, %s1364_s12  ;;  %s332_s28 = sand.u32 (!%p297_p6), 1, %s1258_s30  }
   0xb   : > { %300 = sbr.rel (%p297_p6) target bundleno = 948 (0x3b4), region = 56 }
   0xc   : > { %p340_p7 = scmp.lt.s32.totalorder (!%p297_p6), %s1387_s22, 12 }
  0x10   : > { %v1015_v0 = vld [vmem:[%s1559_s1 + $0x8] sm:$0xf]  ;;  %v1074_v1 = vld [vmem:[%s1559_s1 + $0x8] sm:$0x70]  ;;  %vm398_vm0 = vcmask 1046528   ;;  %v1073_v4 = vld [vmem:[%s1559_s1] sm:$0xff] }
  0x11   : > { %v1016_v2 = vor.u32 %v1074_v1, %v1015_v0  ;;  %s341_s25 = scalar_select %p340_p7, %s1387_s22, 12  ;;  %vm385_vm1 = vcmask 244736   ;;  %v1035_v16 = vld [vmem:[%s1561_s3 + $0x18] sm:$0xf]  ;;  %v1078_v17 = vld [vmem:[%s1561_s3 + $0x18] sm:$0x30] }
  0x12   : > { %v1036_v18 = vor.u32 %v1078_v17, %v1035_v16  ;;  %vm489_vm2 = vcmask 1045504   ;;  %v1077_v20 = vld [vmem:[%s1561_s3 + $0x10] sm:$0xff]  ;;  %v1076_v21 = vld [vmem:[%s1561_s3 + $0x8] sm:$0xff]  ;;  %v1075_v22 = vld [vmem:[%s1561_s3] sm:$0xff]  ;;  %vm476_vm3 = vcmask 490496   ;;  %vm629_vm4 = vcmask 1047552  }
  0x13   : > { %v400_v3 = vsel %vm398_vm0, %v1016_v2, 0  ;;  %s1008_s26 = sshll.u32 %s341_s25, 3  ;;  %v1174_v24 = vld [vmem:[%s1560_s2] ss:$0 sm:$0xff]  ;;  %v1047_v50 = vld [vmem:[%s1563_s5 + $0x8] sm:$0xf] }
  0x14   : > { %408 = vmatpush.bf16.msra.mxu0 %v400_v3  ;;  %s343_s29 = scalar_lea.vmem %s1558_s0, %s1008_s26  ;;  %v491_v19 = vsel %vm489_vm2, %v1036_v18, 0  ;;  %v1080_v51 = vld [vmem:[%s1563_s5 + $0x8] sm:$0x70]  ;;  %v1079_v54 = vld [vmem:[%s1563_s5] sm:$0xff]  ;;  %vm616_vm5 = vcmask 121856   ;;  %vm663_vm6 = vcmask 80896  }
  0x15   : > { %v355_v5 = vld [vmem:[%s343_s29] sm:$0xff]  ;;  %v356_v6 = vld [vmem:[%s343_s29 + $0x8] sm:$0xff]  ;;  %v357_v8 = vld [vmem:[%s343_s29 + $0x10] sm:$0xff]  ;;  %497 = vmatpush.bf16.msra.mxu1 %v491_v19  ;;  %v1048_v52 = vor.u32 %v1080_v51, %v1047_v50  ;;  %v1300_v19 = vmov 65535   ;;  %s770_s30 = ssub.s32 (%p1376_p4), 13, %s1387_s22  ;;  %s1082_s14 = smul.u32 (%p1376_p4), 56, %s1364_s12 }
  0x16   : > { %v362_v7 = vpack.c.bf16 %v356_v6, %v355_v5  ;;  %v358_v9 = vld [vmem:[%s343_s29 + $0x18] sm:$0xff]  ;;  %v359_v11 = vld [vmem:[%s343_s29 + $0x20] sm:$0xff]  ;;  %v360_v12 = vld [vmem:[%s343_s29 + $0x28] sm:$0xff]  ;;  %p771_p8 = scmp.lt.s32.totalorder (%p1376_p4), %s770_s30, 7 }
  0x17   : > { %v363_v10 = vpack.c.bf16 %v358_v9, %v357_v8  ;;  %v364_v13 = vpack.c.bf16 %v360_v12, %v359_v11  ;;  %v361_v14 = vld [vmem:[%s343_s29 + $0x30] sm:$0xff]  ;;  %v564_v53 = vsel %vm398_vm0, %v1048_v52, 0  ;;  %v1175_v56 = vld [vmem:[%s1562_s4] ss:$0 sm:$0xff]  ;;  %s1083_s29 = smul.u32 56, %s332_s28  ;;  %s1505_s19 = scalar_lea.vmem (%p1376_p4), %s1567_s9, %s1082_s14  }
  0x18   : > { %409 = vmatpush.bf16.msra.mxu0 %v1073_v4  ;;  %v365_v15 = vpack.c.bf16 %v361_v14, %v361_v14  ;;  %572 = vmatpush.bf16.msra.mxu2 %v564_v53  ;;  %v1081_v18 = vld [vmem:[%s1565_s7] sm:$0xff] }
  0x19   : > { %498 = vmatpush.bf16.msra.mxu1 %v1077_v20  ;;  %v630_v20 = vsel %vm398_vm0, 4294967295, %v1300_v19  ;;  %v1177_v50 = vld [vmem:[%s1566_s8] ss:$0 sm:$0xff]  ;;  %s1480_s11 = scalar_lea.vmem [#allocation2], %s1083_s29  }
  0x1b   : > { %1017 = vmatmul.msk.bf16.vlgmr.msra.gmra.mxu0 %vm385_vm1, %v362_v7 }
  0x1c   : > { %573 = vmatpush.bf16.msra.mxu2 %v1079_v54 }
  0x1d   : > { %499 = vmatpush.bf16.msra.mxu1 %v1076_v21  ;;  %v631_v21 = vsel %vm629_vm4, %v630_v20, 0 }
  0x21   : > { %500 = vmatpush.bf16.msra.mxu1 %v1075_v22  ;;  %v633_v22 = vand.u32 %v1081_v18, %v631_v21 }
  0x23   : > { %642 = vmatpush.bf16.msra.mxu3 %v633_v22 }
  0x2b   : > { %1018 = vmatmul.msk.bf16.gmra.mxu0 %vm385_vm1, %v363_v10 }
  0x3b   : > { %1019 = vmatmul.msk.bf16.gmra.mxu0 %vm385_vm1, %v364_v13 }
  0x4b   : > { %1020 = vmatmul.msk.bf16.gmra.mxu0 %vm385_vm1, %v365_v15 }
  0x98   : > { %v411_v23 = vpop.f32.mrf.mxu0 }
  0x99   : > { %v412_v25 = vadd.f32 %v1174_v24, %v411_v23 }
  0x9b   : > { %v430_v28 = vmax.f32 %v412_v25, 0.0 }
  0xa0   : > { %v413_v26 = vpop.f32.mrf.mxu0 }
  0xa1   : > { %v414_v27 = vadd.f32 %v1174_v24, %v413_v26 }
  0xa3   : > { %v431_v29 = vmax.f32 %v414_v27, 0.0 }
  0xa5   : > { %v437_v30 = vpack.c.bf16 %v431_v29, %v430_v28 }
  0xa7   : > { %1037 = vmatmul.msk.bf16.vlgmr.msra.gmra.mxu1 %vm476_vm3, %v437_v30 }
  0xa8   : > { %v416_v31 = vpop.f32.mrf.mxu0 }
  0xa9   : > { %v417_v32 = vadd.f32 %v1174_v24, %v416_v31 }
  0xab   : > { %v432_v35 = vmax.f32 %v417_v32, 0.0 }
  0xb0   : > { %v418_v33 = vpop.f32.mrf.mxu0 }
  0xb1   : > { %v419_v34 = vadd.f32 %v1174_v24, %v418_v33 }
  0xb3   : > { %v433_v36 = vmax.f32 %v419_v34, 0.0 }
  0xb5   : > { %v438_v37 = vpack.c.bf16 %v433_v36, %v432_v35 }
  0xb7   : > { %1038 = vmatmul.msk.bf16.gmra.mxu1 %vm476_vm3, %v438_v37 }
  0xb8   : > { %v421_v38 = vpop.f32.mrf.mxu0 }
  0xb9   : > { %v422_v39 = vadd.f32 %v1174_v24, %v421_v38 }
  0xbb   : > { %v434_v42 = vmax.f32 %v422_v39, 0.0 }
  0xc0   : > { %v423_v40 = vpop.f32.mrf.mxu0 }
  0xc1   : > { %v424_v41 = vadd.f32 %v1174_v24, %v423_v40 }
  0xc3   : > { %v435_v43 = vmax.f32 %v424_v41, 0.0 }
  0xc5   : > { %v439_v44 = vpack.c.bf16 %v435_v43, %v434_v42 }
  0xc7   : > { %1039 = vmatmul.msk.bf16.gmra.mxu1 %vm476_vm3, %v439_v44 }
  0xc8   : > { %v426_v45 = vpop.f32.mrf.mxu0 }
  0xc9   : > { %v427_v46 = vadd.f32 %v1174_v24, %v426_v45  ;;  %v1176_v24 = vld [vmem:[%s1564_s6] ss:$0 sm:$0xff] }
  0xcb   : > { %v436_v47 = vmax.f32 %v427_v46, 0.0 }
  0xcd   : > { %v440_v49 = vpack.c.bf16 %v436_v47, %v436_v47 }
  0xd0   : > { %v428_v48 = vpop.f32.mrf.mxu0 }
  0xd7   : > { %1040 = vmatmul.msk.bf16.gmra.mxu1 %vm476_vm3, %v440_v49 }
 0x124   : > { %v502_v55 = vpop.f32.mrf.mxu1 }
 0x125   : > { %v503_v57 = vadd.f32 %v1175_v56, %v502_v55 }
 0x127   : > { %v521_v60 = vmax.f32 %v503_v57, 0.0 }
 0x12c   : > { %v504_v58 = vpop.f32.mrf.mxu1 }
 0x12d   : > { %v505_v59 = vadd.f32 %v1175_v56, %v504_v58 }
 0x12f   : > { %v522_v61 = vmax.f32 %v505_v59, 0.0 }
 0x131   : > { %v528_v62 = vpack.c.bf16 %v522_v61, %v521_v60 }
 0x133   : > { %1049 = vmatmul.msk.bf16.vlgmr.msra.gmra.mxu2 %vm385_vm1, %v528_v62 }
 0x134   : > { %v507_v63 = vpop.f32.mrf.mxu1 }
 0x135   : > { %v508_v0 = vadd.f32 %v1175_v56, %v507_v63 }
 0x137   : > { %v523_v3 = vmax.f32 %v508_v0, 0.0 }
 0x13c   : > { %v509_v1 = vpop.f32.mrf.mxu1 }
 0x13d   : > { %v510_v2 = vadd.f32 %v1175_v56, %v509_v1 }
 0x13f   : > { %v524_v4 = vmax.f32 %v510_v2, 0.0 }
 0x141   : > { %v529_v5 = vpack.c.bf16 %v524_v4, %v523_v3 }
 0x143   : > { %1050 = vmatmul.msk.bf16.gmra.mxu2 %vm385_vm1, %v529_v5 }
 0x144   : > { %v512_v6 = vpop.f32.mrf.mxu1 }
 0x145   : > { %v513_v7 = vadd.f32 %v1175_v56, %v512_v6 }
 0x147   : > { %v525_v10 = vmax.f32 %v513_v7, 0.0 }
 0x14c   : > { %v514_v8 = vpop.f32.mrf.mxu1 }
 0x14d   : > { %v515_v9 = vadd.f32 %v1175_v56, %v514_v8 }
 0x14f   : > { %v526_v11 = vmax.f32 %v515_v9, 0.0 }
 0x151   : > { %v530_v12 = vpack.c.bf16 %v526_v11, %v525_v10 }
 0x153   : > { %1051 = vmatmul.msk.bf16.gmra.mxu2 %vm385_vm1, %v530_v12 }
 0x154   : > { %v517_v13 = vpop.f32.mrf.mxu1 }
 0x155   : > { %v518_v14 = vadd.f32 %v1175_v56, %v517_v13 }
 0x157   : > { %v527_v15 = vmax.f32 %v518_v14, 0.0 }
 0x159   : > { %v531_v17 = vpack.c.bf16 %v527_v15, %v527_v15 }
 0x15c   : > { %v519_v16 = vpop.f32.mrf.mxu1 }
 0x163   : > { %1052 = vmatmul.msk.bf16.gmra.mxu2 %vm385_vm1, %v531_v17 }
 0x1b6   : > { %v575_v23 = vpop.f32.mrf.mxu2 }
 0x1b7   : > { %v576_v25 = vadd.f32 %v1176_v24, %v575_v23 }
 0x1b9   : > { %v594_v28 = vmax.f32 %v576_v25, 0.0 }
 0x1be   : > { %v577_v26 = vpop.f32.mrf.mxu2 }
 0x1bf   : > { %v578_v27 = vadd.f32 %v1176_v24, %v577_v26 }
 0x1c1   : > { %v595_v29 = vmax.f32 %v578_v27, 0.0 }
 0x1c3   : > { %v601_v30 = vpack.c.bf16 %v595_v29, %v594_v28 }
 0x1c5   : > { %1057 = vmatmul.msk.bf16.vlgmr.msra.gmra.mxu3 %vm616_vm5, %v601_v30 }
 0x1c6   : > { %v580_v31 = vpop.f32.mrf.mxu2 }
 0x1c7   : > { %v581_v32 = vadd.f32 %v1176_v24, %v580_v31 }
 0x1c9   : > { %v596_v35 = vmax.f32 %v581_v32, 0.0 }
 0x1ce   : > { %v582_v33 = vpop.f32.mrf.mxu2 }
 0x1cf   : > { %v583_v34 = vadd.f32 %v1176_v24, %v582_v33 }
 0x1d1   : > { %v597_v36 = vmax.f32 %v583_v34, 0.0 }
 0x1d3   : > { %v602_v37 = vpack.c.bf16 %v597_v36, %v596_v35 }
 0x1d5   : > { %1058 = vmatmul.msk.bf16.gmra.mxu3 %vm616_vm5, %v602_v37 }
 0x1d6   : > { %v585_v38 = vpop.f32.mrf.mxu2 }
 0x1d7   : > { %v586_v39 = vadd.f32 %v1176_v24, %v585_v38 }
 0x1d9   : > { %v598_v42 = vmax.f32 %v586_v39, 0.0 }
 0x1de   : > { %v587_v40 = vpop.f32.mrf.mxu2 }
 0x1df   : > { %v588_v41 = vadd.f32 %v1176_v24, %v587_v40 }
 0x1e1   : > { %v599_v43 = vmax.f32 %v588_v41, 0.0 }
 0x1e3   : > { %v603_v44 = vpack.c.bf16 %v599_v43, %v598_v42 }
 0x1e5   : > { %1059 = vmatmul.msk.bf16.gmra.mxu3 %vm616_vm5, %v603_v44 }
 0x1e6   : > { %v590_v45 = vpop.f32.mrf.mxu2 }
 0x1e7   : > { %v591_v46 = vadd.f32 %v1176_v24, %v590_v45 }
 0x1e9   : > { %v600_v47 = vmax.f32 %v591_v46, 0.0 }
 0x1eb   : > { %v604_v49 = vpack.c.bf16 %v600_v47, %v600_v47 }
 0x1ee   : > { %v592_v48 = vpop.f32.mrf.mxu2 }
 0x1f5   : > { %1060 = vmatmul.msk.bf16.gmra.mxu3 %vm616_vm5, %v604_v49 }
 0x248   : > { %v644_v51 = vpop.f32.mrf.mxu3 }
 0x249   : > { %v645_v52 = vadd.f32 %v1177_v50, %v644_v51 }
 0x24b   : > { %v664_v53 = vsel %vm663_vm6, %v645_v52, -inf }
 0x24c   : > { %665 = vmax.xlane.f32.xlu0 %v664_v53 }
 0x250   : > { %v646_v54 = vpop.f32.mrf.mxu3 }
 0x251   : > { %v647_v55 = vadd.f32 %v1177_v50, %v646_v54 }
 0x253   : > { %v667_v56 = vsel %vm663_vm6, %v647_v55, -inf }
 0x254   : > { %668 = vmax.xlane.f32.xlu0 %v667_v56 }
 0x258   : > { %v649_v57 = vpop.f32.mrf.mxu3 }
 0x259   : > { %v650_v58 = vadd.f32 %v1177_v50, %v649_v57 }
 0x25b   : > { %v670_v59 = vsel %vm663_vm6, %v650_v58, -inf }
 0x25c   : > { %671 = vmax.xlane.f32.xlu1 %v670_v59 }
 0x260   : > { %v651_v60 = vpop.f32.mrf.mxu3 }
 0x261   : > { %v652_v61 = vadd.f32 %v1177_v50, %v651_v60 }
 0x263   : > { %v673_v62 = vsel %vm663_vm6, %v652_v61, -inf }
 0x264   : > { %674 = vmax.xlane.f32.xlu1 %v673_v62 }
 0x268   : > { %v654_v63 = vpop.f32.mrf.mxu3 }
 0x269   : > { %v655_v0 = vadd.f32 %v1177_v50, %v654_v63 }
 0x26b   : > { %v676_v1 = vsel %vm663_vm6, %v655_v0, -inf }
 0x26c   : > { %677 = vmax.xlane.f32.xlu2 %v676_v1 }
 0x270   : > { %v656_v2 = vpop.f32.mrf.mxu3 }
 0x271   : > { %v657_v3 = vadd.f32 %v1177_v50, %v656_v2 }
 0x273   : > { %v679_v4 = vsel %vm663_vm6, %v657_v3, -inf }
 0x274   : > { %680 = vmax.xlane.f32.xlu2 %v679_v4 }
 0x278   : > { %v659_v5 = vpop.f32.mrf.mxu3 }
 0x279   : > { %v660_v6 = vadd.f32 %v1177_v50, %v659_v5 }
 0x27b   : > { %v682_v7 = vsel %vm663_vm6, %v660_v6, -inf }
 0x27c   : > { %683 = vmax.xlane.f32.xlu0 %v682_v7 }
 0x280   : > { %v661_v8 = vpop.f32.mrf.mxu3 }
 0x2bf   : > { %v666_v9 = vpop.xlane.xlu0 %665 }
 0x2c0   : > { %v685_v10 = vsub.f32 %v645_v52, %v666_v9 }
 0x2c2   : > { %v1462_v11 = vmin.f32 %v685_v10, 0.0 }
 0x2c4   : > { %v699_v12 = vmul.f32 1.442695, %v1462_v11 }
 0x2c6   : > { %1178 = vpow2.f32 %v699_v12 }
 0x2c7   : > { %v669_v13 = vpop.xlane.xlu0 %668 }
 0x2c8   : > { %v686_v14 = vsub.f32 %v647_v55, %v669_v13 }
 0x2ca   : > { %v1465_v15 = vmin.f32 %v686_v14, 0.0 }
 0x2cc   : > { %v1179_v16 = vpop.eup %1178  ;;  %v701_v17 = vmul.f32 1.442695, %v1465_v15 }
 0x2cd   : > { %v713_v18 = vsel %vm663_vm6, %v1179_v16, 0.0 }
 0x2ce   : > { %1180 = vpow2.f32 %v701_v17  ;;  %714 = vadd.xlane.f32.xlu1 %v713_v18 }
 0x2cf   : > { %v672_v19 = vpop.xlane.xlu1 %671 }
 0x2d0   : > { %v687_v20 = vsub.f32 %v650_v58, %v672_v19 }
 0x2d2   : > { %v1469_v21 = vmin.f32 %v687_v20, 0.0 }
 0x2d4   : > { %v1181_v22 = vpop.eup %1180  ;;  %v703_v23 = vmul.f32 1.442695, %v1469_v21 }
 0x2d5   : > { %v716_v24 = vsel %vm663_vm6, %v1181_v22, 0.0 }
 0x2d6   : > { %1182 = vpow2.f32 %v703_v23  ;;  %717 = vadd.xlane.f32.xlu2 %v716_v24 }
 0x2d7   : > { %v675_v25 = vpop.xlane.xlu1 %674 }
 0x2d8   : > { %v688_v26 = vsub.f32 %v652_v61, %v675_v25 }
 0x2da   : > { %v695_v27 = vmin.f32 %v688_v26, 0.0 }
 0x2dc   : > { %v1183_v28 = vpop.eup %1182  ;;  %v705_v29 = vmul.f32 1.442695, %v695_v27 }
 0x2dd   : > { %v719_v30 = vsel %vm663_vm6, %v1183_v28, 0.0 }
 0x2de   : > { %1184 = vpow2.f32 %v705_v29  ;;  %720 = vadd.xlane.f32.xlu0 %v719_v30 }
 0x2df   : > { %v678_v31 = vpop.xlane.xlu2 %677 }
 0x2e0   : > { %v689_v32 = vsub.f32 %v655_v0, %v678_v31 }
 0x2e2   : > { %v696_v33 = vmin.f32 %v689_v32, 0.0 }
 0x2e4   : > { %v1185_v34 = vpop.eup %1184  ;;  %v707_v35 = vmul.f32 1.442695, %v696_v33 }
 0x2e5   : > { %v722_v36 = vsel %vm663_vm6, %v1185_v34, 0.0 }
 0x2e6   : > { %1186 = vpow2.f32 %v707_v35  ;;  %723 = vadd.xlane.f32.xlu1 %v722_v36 }
 0x2e7   : > { %v681_v37 = vpop.xlane.xlu2 %680 }
 0x2e8   : > { %v690_v38 = vsub.f32 %v657_v3, %v681_v37 }
 0x2ea   : > { %v697_v39 = vmin.f32 %v690_v38, 0.0 }
 0x2ec   : > { %v1187_v40 = vpop.eup %1186  ;;  %v709_v41 = vmul.f32 1.442695, %v697_v39 }
 0x2ed   : > { %v725_v42 = vsel %vm663_vm6, %v1187_v40, 0.0 }
 0x2ee   : > { %1188 = vpow2.f32 %v709_v41  ;;  %726 = vadd.xlane.f32.xlu2 %v725_v42 }
 0x2ef   : > { %v684_v43 = vpop.xlane.xlu0 %683 }
 0x2f0   : > { %v691_v44 = vsub.f32 %v660_v6, %v684_v43 }
 0x2f2   : > { %v698_v45 = vmin.f32 %v691_v44, 0.0 }
 0x2f4   : > { %v1189_v46 = vpop.eup %1188  ;;  %v711_v47 = vmul.f32 1.442695, %v698_v45 }
 0x2f5   : > { %v728_v48 = vsel %vm663_vm6, %v1189_v46, 0.0 }
 0x2f6   : > { %1190 = vpow2.f32 %v711_v47  ;;  %729 = vadd.xlane.f32.xlu0 %v728_v48 }
 0x2fc   : > { %v1191_v49 = vpop.eup %1190 }
 0x2fd   : > { %v731_v50 = vsel %vm663_vm6, %v1191_v49, 0.0 }
 0x2fe   : > { %732 = vadd.xlane.f32.xlu1 %v731_v50 }
 0x341   : > { %v715_v51 = vpop.xlane.xlu1 %714 }
 0x342   : > { %1192 = vlog2.f32 %v715_v51 }
 0x348   : > { %v1193_v52 = vpop.eup %1192 }
 0x349   : > { %v735_v53 = vmul.f32 0.6931472, %v1193_v52  ;;  %v718_v54 = vpop.xlane.xlu2 %717 }
 0x34a   : > { %1194 = vlog2.f32 %v718_v54 }
 0x34b   : > { %v748_v55 = vsub.f32 %v1462_v11, %v735_v53 }
 0x34d   : > { %755 = vst.msk [vmem:[%s1480_s11] sm:$0xff] %vm663_vm6, %v748_v55 }
 0x350   : > { %v1195_v56 = vpop.eup %1194 }
 0x351   : > { %v737_v57 = vmul.f32 0.6931472, %v1195_v56  ;;  %v721_v58 = vpop.xlane.xlu0 %720 }
 0x352   : > { %1196 = vlog2.f32 %v721_v58 }
 0x353   : > { %v749_v59 = vsub.f32 %v1465_v15, %v737_v57 }
 0x355   : > { %756 = vst.msk [vmem:[%s1480_s11 + $0x8] sm:$0xff] %vm663_vm6, %v749_v59 }
 0x358   : > { %v1197_v60 = vpop.eup %1196 }
 0x359   : > { %v739_v61 = vmul.f32 0.6931472, %v1197_v60  ;;  %v724_v62 = vpop.xlane.xlu1 %723 }
 0x35a   : > { %1198 = vlog2.f32 %v724_v62 }
 0x35b   : > { %v750_v63 = vsub.f32 %v1469_v21, %v739_v61 }
 0x35d   : > { %757 = vst.msk [vmem:[%s1480_s11 + $0x10] sm:$0xff] %vm663_vm6, %v750_v63 }
 0x360   : > { %v1199_v0 = vpop.eup %1198 }
 0x361   : > { %v741_v1 = vmul.f32 0.6931472, %v1199_v0  ;;  %v727_v2 = vpop.xlane.xlu2 %726 }
 0x362   : > { %1200 = vlog2.f32 %v727_v2 }
 0x363   : > { %v751_v3 = vsub.f32 %v695_v27, %v741_v1 }
 0x365   : > { %758 = vst.msk [vmem:[%s1480_s11 + $0x18] sm:$0xff] %vm663_vm6, %v751_v3 }
 0x368   : > { %v1201_v4 = vpop.eup %1200 }
 0x369   : > { %v743_v5 = vmul.f32 0.6931472, %v1201_v4  ;;  %v730_v6 = vpop.xlane.xlu0 %729 }
 0x36a   : > { %1202 = vlog2.f32 %v730_v6 }
 0x36b   : > { %v752_v7 = vsub.f32 %v696_v33, %v743_v5 }
 0x36d   : > { %759 = vst.msk [vmem:[%s1480_s11 + $0x20] sm:$0xff] %vm663_vm6, %v752_v7 }
 0x370   : > { %v1203_v8 = vpop.eup %1202 }
 0x371   : > { %v745_v9 = vmul.f32 0.6931472, %v1203_v8  ;;  %v733_v10 = vpop.xlane.xlu1 %732 }
 0x372   : > { %1204 = vlog2.f32 %v733_v10 }
 0x373   : > { %v753_v11 = vsub.f32 %v697_v39, %v745_v9 }
 0x375   : > { %760 = vst.msk [vmem:[%s1480_s11 + $0x28] sm:$0xff] %vm663_vm6, %v753_v11 }
 0x378   : > { %v1205_v12 = vpop.eup %1204 }
 0x379   : > { %v747_v13 = vmul.f32 0.6931472, %v1205_v12  ;;  %768 = sbr.rel (!%p1376_p4) target bundleno = 948 (0x3b4), region = 60 }
 0x37b   : > { %v754_v14 = vsub.f32 %v698_v45, %v747_v13 }
 0x37d   : > { %761 = vst.msk [vmem:[%s1480_s11 + $0x30] sm:$0xff] %vm663_vm6, %v754_v14 }
 0x37e   : > { %s1576_s30 = smov (!%p771_p8, %s770_s30), 7 }
 0x37f   : > { %s1061_s20 = sshll.u32 %s1576_s30, 3 }
 0x380   : > { %p1064_p9 = scmp.eq.s32.totalorder %s1061_s20, 0 }
 0x381   : > { %1206 = sdivrem.u32 (!%p1064_p9), %s1576_s30, 7 }
 0x382   : > { %779 = sbr.rel (%p1064_p9) target bundleno = 948 (0x3b4), region = 64 }
 0x38a   : > { %s1511_s17 = spop.drf %1206 }
 0x38b   : > { %s1208_s21 = spop.drf %1206  ;;  %p1065_p10 = scmp.le.s32.totalorder %s1511_s17, 0 }
 0x38c   : > { %s1569_s12 = smov (!%p1065_p10), %s1505_s19  ;;  %s1570_s22 = smov (!%p1065_p10), %s1480_s11 }
 0x38d   : > { %960 = sbr.rel (%p1065_p10) target bundleno = 922 (0x39a), region = 140  ;;  %s1520_s23 = smov (!%p1065_p10), 0  }
 0x38e   : > { %s1522_s24 = smov (!%p1065_p10), 0  }
 0x392 LB: >> { %v856_v15 = vld [vmem:[%s1274_s22] sm:$0xff]  ;;  %v858_v16 = vld [vmem:[%s1274_s22 + $0x8] sm:$0xff]  ;;  %v860_v17 = vld [vmem:[%s1274_s22 + $0x10] sm:$0xff]  ;;  %s870_s25 = sadd.s32 1, %s1278_s23  ;;  %s850_s24 = sadd.s32 1, %s1282_s24   ;;  %s1282_s24 = sphi %s1522_s24, %s850_s24   ;;  %s1278_s23 = sphi %s1520_s23, %s1571_s23   ;;  %s1274_s22 = sphi %s1570_s22, %s875_s22   ;;  %s1270_s12 = sphi %s1569_s12, %s876_s12  }
 0x393   : >> { %857 = vst [vmem:[%s1270_s12] sm:$0xff] %v856_v15  ;;  %v862_v18 = vld [vmem:[%s1274_s22 + $0x18] sm:$0xff]  ;;  %p871_p11 = scmp.ge.s32.totalorder %s870_s25, %s1511_s17  ;;  %v864_v19 = vld [vmem:[%s1274_s22 + $0x20] sm:$0xff]  ;;  %v866_v20 = vld [vmem:[%s1274_s22 + $0x28] sm:$0xff]  ;;  %p849_p12 = scmp.ge.s32.totalorder %s850_s24, %s1511_s17 }
 0x394   : >> { %859 = vst [vmem:[%s1270_s12 + $0x8] sm:$0xff] %v858_v16  ;;  %v868_v21 = vld [vmem:[%s1274_s22 + $0x30] sm:$0xff] }
 0x395   : >> { %861 = vst [vmem:[%s1270_s12 + $0x10] sm:$0xff] %v860_v17  ;;  %s1578_s25 = smov (%p871_p11, %s870_s25), 0  ;;  %852 = sbr.rel (!%p849_p12) target bundleno = 914 (0x392), region = 146 }
 0x396   : >> { %863 = vst [vmem:[%s1270_s12 + $0x18] sm:$0xff] %v862_v18  ;;  %s873_s26 = smul.u32 56, %s1578_s25  ;;  %s1571_s23 = smov %s1578_s25 }
 0x397   : >> { %865 = vst [vmem:[%s1270_s12 + $0x20] sm:$0xff] %v864_v19 }
 0x398   : >> { %867 = vst [vmem:[%s1270_s12 + $0x28] sm:$0xff] %v866_v20  ;;  %s875_s22 = scalar_lea.vmem %s1480_s11, %s873_s26 [#allocation2]  }
 0x399   : >> { %869 = vst [vmem:[%s1270_s12 + $0x30] sm:$0xff] %v868_v21  ;;  %s876_s12 = scalar_lea.vmem %s1505_s19, %s873_s26  }
 0x39a PF: > { %1209 = sdivrem.u32 %s1576_s30, 7 }
 0x39b   : > { %s1066_s27 = smul.u32 56, %s1511_s17 }
 0x39d   : > { %s1543_s28 = scalar_lea.vmem %s1480_s11, %s1066_s27 [#allocation2]   ;;  %s883_s29 = scalar_lea.vmem %s1505_s19, %s1066_s27  }
 0x3a3   : > { %s1210_s14 = spop.drf %1209 }
 0x3a4   : > { %s1211_s15 = spop.drf %1209 }
 0x3a5   : > { %p1068_p13 = scmp.le.s32.totalorder %s1211_s15, 0 }
 0x3a6   : > { %s1284_s18 = smov (!%p1068_p13), %s883_s29   ;;  %s1288_s20 = smov (!%p1068_p13), %s1543_s28  }
 0x3a7   : > { %974 = sbr.rel (%p1068_p13) target bundleno = 948 (0x3b4), region = 151  ;;  %s1292_s21 = smov (!%p1068_p13), 0  }
 0x3a8   : > { %s1296_s24 = smov (!%p1068_p13), 0  }
 0x3ac LB: >> { %v893_v22 = vld [vmem:[%s1290_s20] sm:$0xff]  ;;  %s895_s11 = sadd.s32 1, %s1294_s21  ;;  %s887_s24 = sadd.s32 1, %s1298_s24   ;;  %s1298_s24 = sphi %s1296_s24, %s887_s24   ;;  %s1294_s21 = sphi %s1292_s21, %s1293_s21   ;;  %s1290_s20 = sphi %s1288_s20, %s900_s20   ;;  %s1286_s18 = sphi %s1284_s18, %s901_s18  }
 0x3ad   : >> { %894 = vst [vmem:[%s1286_s18] sm:$0xff] %v893_v22  ;;  %p896_p0 = scmp.ge.s32.totalorder %s895_s11, %s1211_s15  ;;  %p886_p1 = scmp.ge.s32.totalorder %s887_s24, %s1211_s15 }
 0x3af   : >> { %s1580_s11 = smov (%p896_p0, %s895_s11), 0  ;;  %889 = sbr.rel (!%p886_p1) target bundleno = 940 (0x3ac), region = 157 }
 0x3b0   : >> { %s1069_s30 = sshll.u32 %s1580_s11, 3  ;;  %s1293_s21 = smov %s1580_s11  }
 0x3b1   : >> { %s900_s20 = scalar_lea.vmem %s1543_s28, %s1069_s30 [#allocation2]   ;;  %s901_s18 = scalar_lea.vmem %s883_s29, %s1069_s30  }
 0x3b4 PF: > { %p16_p2 = scmp.ge.s32.totalorder %s1366_s13, 4   ;;  %s1572_s30 = smov %s1262_s10 }
 0x3b5   : > { %s1573_s10 = smov %s1374_s16  ;;  %s1574_s11 = smov %s1366_s13 }
 0x3b6   :  { %18 = sbr.rel (!%p16_p2) target bundleno = 2 (0x2), region = 168 }

</bundles_post_ra>
